<compile_context>
chip_gen: v5e
topology: v5e:2x2
jax: 0.10.0
libtpu: 0.0.40
codegen_flags: <defaults>
</compile_context>

<pallas_src>
import functools

import jax
import jax.numpy as jnp
from jax import lax
from jax.experimental import pallas as pl
from jax.experimental.pallas import tpu as pltpu


def rnn_chunk_kernel(xproj_ref, whh_ref, hseq_ref, h_sc, *, t_chunk, activation):
    """One grid step == t_chunk RNN time steps (grid axis runs sequentially)."""

    # h0 = zeros (the PyTorch module builds torch.zeros when h is None).
    @pl.when(pl.program_id(0) == 0)
    def _():
        h_sc[...] = jnp.zeros_like(h_sc)

    w = whh_ref[...]  # (H_pad, H_pad) recurrent weights, resident across the grid.
    if activation == "tanh":
        act = jnp.tanh
    else:  # 'relu'
        act = lambda v: jnp.maximum(v, 0.0)

    def step(t, h):
        # Serial critical path per time step:
        # one (B_pad,H_pad)x(H_pad,H_pad) matmul + one add + activation.
        pre = jnp.dot(h.astype(w.dtype), w, preferred_element_type=jnp.float32)
        h_new = act(pre + xproj_ref[t])
        hseq_ref[t] = h_new.astype(hseq_ref.dtype)
        return h_new

    # t_chunk is static -> fully unrolled for LLO scheduler visibility.
    h_sc[...] = lax.fori_loop(0, t_chunk, step, h_sc[...], unroll=True)


def rnn_forward(x, w_ih, b_ih, w_hh, b_hh, *, activation="tanh",
                t_chunk=8, param_dtype=jnp.float32):
    """
    x     : (S, B, I)   time-major input (same layout as the PyTorch module)
    w_ih  : (H, I)      nn.Linear(input_size, hidden_size).weight
    b_ih  : (H,)
    w_hh  : (H, H)      nn.Linear(hidden_size, hidden_size).weight
    b_hh  : (H,)
    returns (h_seq (S, B, H), h_last (1, B, H))
    """
    S, B, I = x.shape
    H = w_ih.shape[0]

    x = jnp.asarray(x, jnp.float32)
    w_ih = jnp.asarray(w_ih, jnp.float32)
    w_hh = jnp.asarray(w_hh, jnp.float32)
    b_ih = jnp.asarray(b_ih, jnp.float32)
    b_hh = jnp.asarray(b_hh, jnp.float32)

    # ---- hoisted, time-parallel input projection (one big MXU matmul) ------
    # Folds both loop-invariant biases once, so the kernel never touches them.
    x_proj = (x.reshape(S * B, I) @ w_ih.T + (b_ih + b_hh)).reshape(S, B, H)

    # ---- pad to hardware tiles: 128 lanes (hidden), 8 sublanes (batch) -----
    H_pad = pl.cdiv(H, 128) * 128
    B_pad = pl.cdiv(B, 8) * 8
    T = max(1, min(t_chunk, S))
    S_pad = pl.cdiv(S, T) * T

    x_proj_p = jnp.zeros((S_pad, B_pad, H_pad), jnp.float32).at[:S, :B, :H].set(x_proj)
    whh_t_p = (jnp.zeros((H_pad, H_pad), jnp.float32)
               .at[:H, :H].set(w_hh.T)
               .astype(param_dtype))

    kernel = functools.partial(rnn_chunk_kernel, t_chunk=T, activation=activation)

    grid_spec = pltpu.PrefetchScalarGridSpec(
        num_scalar_prefetch=0,
        grid=(S_pad // T,),
        in_specs=[
            pl.BlockSpec((T, B_pad, H_pad), lambda c: (c, 0, 0)),  # x_proj chunk
            pl.BlockSpec((H_pad, H_pad), lambda c: (0, 0)),        # W_hh^T (resident)
        ],
        out_specs=pl.BlockSpec((T, B_pad, H_pad), lambda c: (c, 0, 0)),  # h_seq chunk
        scratch_shapes=[pltpu.VMEM((B_pad, H_pad), jnp.float32)],        # carried h
    )

    h_seq_p = pl.pallas_call(
        kernel,
        out_shape=jax.ShapeDtypeStruct((S_pad, B_pad, H_pad), jnp.float32),
        grid_spec=grid_spec,
        compiler_params=pltpu.CompilerParams(
            dimension_semantics=("arbitrary",),  # time chunks must run sequentially
        ),
    )(x_proj_p, whh_t_p)

    h_seq = h_seq_p[:S, :B, :H]
    h_last = h_seq[S - 1:S]  # (1, B, H) -- no per-step kernel store needed
    return h_seq, h_last


def rnn_reference(x, w_ih, b_ih, w_hh, b_hh, activation="tanh"):
    """Pure-JAX reference mirroring the PyTorch forward loop."""
    S, B, I = x.shape
    H = w_ih.shape[0]
    act = jnp.tanh if activation == "tanh" else (lambda v: jnp.maximum(v, 0.0))
    h = jnp.zeros((B, H), jnp.float32)
    outs = []
    for t in range(S):
        h = act(h @ w_hh.T + b_hh + x[t] @ w_ih.T + b_ih)
        outs.append(h)
    return jnp.stack(outs, axis=0), h[None]


if __name__ == "__main__":
    # Small, deterministic problem: seq=8, batch=2, input_size=4, hidden=32.
    S, B, I, H = 8, 2, 4, 32
    key = jax.random.PRNGKey(0)
    kx, k1, k2, k3, k4 = jax.random.split(key, 5)

    x = jax.random.normal(kx, (S, B, I), jnp.float32)
    # Deterministic "Linear"-style init (uniform in +-1/sqrt(fan_in)).
    w_ih = jax.random.uniform(k1, (H, I), jnp.float32, -1.0 / I**0.5, 1.0 / I**0.5)
    b_ih = jax.random.uniform(k2, (H,), jnp.float32, -1.0 / I**0.5, 1.0 / I**0.5)
    w_hh = jax.random.uniform(k3, (H, H), jnp.float32, -1.0 / H**0.5, 1.0 / H**0.5)
    b_hh = jax.random.uniform(k4, (H,), jnp.float32, -1.0 / H**0.5, 1.0 / H**0.5)

    ref_seq, ref_last = rnn_reference(x, w_ih, b_ih, w_hh, b_hh)

    # f32 weights: bit-tight against the reference.
    h_seq, h_last = rnn_forward(x, w_ih, b_ih, w_hh, b_hh)
    jax.block_until_ready((h_seq, h_last))
    assert h_seq.shape == (S, B, H) and h_last.shape == (1, B, H)
    assert jnp.allclose(h_seq, ref_seq, atol=1e-5, rtol=1e-5)
    assert jnp.allclose(h_last, ref_last, atol=1e-5, rtol=1e-5)

    # bf16 recurrent weights (f32 accumulate) -- the v6e/v7x fast path.
    h_seq_bf, h_last_bf = rnn_forward(x, w_ih, b_ih, w_hh, b_hh,
                                      param_dtype=jnp.bfloat16)
    jax.block_until_ready((h_seq_bf, h_last_bf))
    assert jnp.allclose(h_seq_bf, ref_seq, atol=2e-2, rtol=2e-2)
    assert jnp.allclose(h_last_bf, ref_last, atol=2e-2, rtol=2e-2)

    # TODO(synk): v7x dual-TensorCore batch split (core_map / parallel batch axis)
    # is not worthwhile at B=2; add a leading "parallel" batch-tile axis for large B.

    print("KERNEL_OK")
</pallas_src>

<mosaic_0001>
module attributes {stable_mosaic.version = 11 : i64} {
  func.func @rnn_chunk_kernel(%arg0: i32, %arg1: memref<8x8x128xf32, #tpu.memory_space<vmem>>, %arg2: memref<128x128xf32, #tpu.memory_space<vmem>>, %arg3: memref<8x8x128xf32, #tpu.memory_space<vmem>>, %arg4: memref<8x128xf32, #tpu.memory_space<vmem>>) attributes {dimension_semantics = [#tpu.dimension_semantics<arbitrary>], iteration_bounds = array<i64: 1>, scalar_prefetch = 0 : i64, scratch_operands = 1 : i64, tpu.core_type = #tpu.core_type<tc>, window_params = [{transform_indices = @transform_0, window_bounds = array<i64: 8, 8, 128>}, {pipeline_mode = #tpu.pipeline_mode<synchronous>, transform_indices = @transform_1, window_bounds = array<i64: 128, 128>}, {transform_indices = @transform_2, window_bounds = array<i64: 8, 8, 128>}]} {
    %c0_i32 = arith.constant 0 : i32
    %0 = arith.cmpi eq, %arg0, %c0_i32 : i32
    %1 = arith.extui %0 : i1 to i32
    %c0_i32_0 = arith.constant 0 : i32
    %2 = arith.cmpi ne, %1, %c0_i32_0 : i32
    scf.if %2 {
      %cst_46 = arith.constant 0.000000e+00 : f32
      %86 = vector.broadcast %cst_46 : f32 to vector<8x128xf32>
      %c0_47 = arith.constant 0 : index
      %c0_48 = arith.constant 0 : index
      %87 = vector.load %arg4[%c0_47, %c0_48] : memref<8x128xf32, #tpu.memory_space<vmem>>, vector<8x128xf32>
      tpu.vector_store %arg4[%c0_47, %c0_48], %86 {strides = array<i32>} : memref<8x128xf32, #tpu.memory_space<vmem>>, vector<8x128xf32>,
    } else {
    }
    %c0 = arith.constant 0 : index
    %c0_1 = arith.constant 0 : index
    %3 = vector.load %arg2[%c0, %c0_1] : memref<128x128xf32, #tpu.memory_space<vmem>>, vector<128x128xf32>
    %c0_2 = arith.constant 0 : index
    %c0_3 = arith.constant 0 : index
    %4 = vector.load %arg4[%c0_2, %c0_3] : memref<8x128xf32, #tpu.memory_space<vmem>>, vector<8x128xf32>
    %c0_i32_4 = arith.constant 0 : i32
    %cst = arith.constant dense<0.000000e+00> : vector<8x128xf32>
    %5 = tpu.matmul %4, %3, %cst {dimension_numbers = #tpu.dot_dimension_numbers<[1], [0], [0], [1], [0, 0, 1, 1], [], []>} : vector<8x128xf32>, vector<128x128xf32>, vector<8x128xf32> -> vector<8x128xf32>
    %6 = arith.index_cast %c0_i32_4 : i32 to index
    %c0_5 = arith.constant 0 : index
    %c0_6 = arith.constant 0 : index
    %7 = vector.load %arg1[%6, %c0_5, %c0_6] : memref<8x8x128xf32, #tpu.memory_space<vmem>>, vector<1x8x128xf32>
    %8 = vector.shape_cast %7 : vector<1x8x128xf32> to vector<8x128xf32>
    %9 = arith.addf %5, %8 : vector<8x128xf32>
    %10 = math.tanh %9 : vector<8x128xf32>
    %11 = arith.index_cast %c0_i32_4 : i32 to index
    %c0_7 = arith.constant 0 : index
    %c0_8 = arith.constant 0 : index
    %12 = vector.load %arg3[%11, %c0_7, %c0_8] : memref<8x8x128xf32, #tpu.memory_space<vmem>>, vector<1x8x128xf32>
    %13 = vector.shape_cast %12 : vector<1x8x128xf32> to vector<8x128xf32>
    %14 = vector.shape_cast %10 : vector<8x128xf32> to vector<1x8x128xf32>
    tpu.vector_store %arg3[%11, %c0_7, %c0_8], %14 {strides = array<i32>} : memref<8x8x128xf32, #tpu.memory_space<vmem>>, vector<1x8x128xf32>,
    %c1_i32 = arith.constant 1 : i32
    %cst_9 = arith.constant dense<0.000000e+00> : vector<8x128xf32>
    %15 = tpu.matmul %10, %3, %cst_9 {dimension_numbers = #tpu.dot_dimension_numbers<[1], [0], [0], [1], [0, 0, 1, 1], [], []>} : vector<8x128xf32>, vector<128x128xf32>, vector<8x128xf32> -> vector<8x128xf32>
    %16 = arith.index_cast %c1_i32 : i32 to index
    %c0_10 = arith.constant 0 : index
    %c0_11 = arith.constant 0 : index
    %17 = vector.load %arg1[%16, %c0_10, %c0_11] : memref<8x8x128xf32, #tpu.memory_space<vmem>>, vector<1x8x128xf32>
    %18 = vector.shape_cast %17 : vector<1x8x128xf32> to vector<8x128xf32>
    %19 = arith.addf %15, %18 : vector<8x128xf32>
    %20 = math.tanh %19 : vector<8x128xf32>
    %21 = arith.index_cast %c1_i32 : i32 to index
    %c0_12 = arith.constant 0 : index
    %c0_13 = arith.constant 0 : index
    %22 = vector.load %arg3[%21, %c0_12, %c0_13] : memref<8x8x128xf32, #tpu.memory_space<vmem>>, vector<1x8x128xf32>
    %23 = vector.shape_cast %22 : vector<1x8x128xf32> to vector<8x128xf32>
    %24 = vector.shape_cast %20 : vector<8x128xf32> to vector<1x8x128xf32>
    tpu.vector_store %arg3[%21, %c0_12, %c0_13], %24 {strides = array<i32>} : memref<8x8x128xf32, #tpu.memory_space<vmem>>, vector<1x8x128xf32>,
    %c2_i32 = arith.constant 2 : i32
    %cst_14 = arith.constant dense<0.000000e+00> : vector<8x128xf32>
    %25 = tpu.matmul %20, %3, %cst_14 {dimension_numbers = #tpu.dot_dimension_numbers<[1], [0], [0], [1], [0, 0, 1, 1], [], []>} : vector<8x128xf32>, vector<128x128xf32>, vector<8x128xf32> -> vector<8x128xf32>
    %26 = arith.index_cast %c2_i32 : i32 to index
    %c0_15 = arith.constant 0 : index
    %c0_16 = arith.constant 0 : index
    %27 = vector.load %arg1[%26, %c0_15, %c0_16] : memref<8x8x128xf32, #tpu.memory_space<vmem>>, vector<1x8x128xf32>
    %28 = vector.shape_cast %27 : vector<1x8x128xf32> to vector<8x128xf32>
    %29 = arith.addf %25, %28 : vector<8x128xf32>
    %30 = math.tanh %29 : vector<8x128xf32>
    %31 = arith.index_cast %c2_i32 : i32 to index
    %c0_17 = arith.constant 0 : index
    %c0_18 = arith.constant 0 : index
    %32 = vector.load %arg3[%31, %c0_17, %c0_18] : memref<8x8x128xf32, #tpu.memory_space<vmem>>, vector<1x8x128xf32>
    %33 = vector.shape_cast %32 : vector<1x8x128xf32> to vector<8x128xf32>
    %34 = vector.shape_cast %30 : vector<8x128xf32> to vector<1x8x128xf32>
    tpu.vector_store %arg3[%31, %c0_17, %c0_18], %34 {strides = array<i32>} : memref<8x8x128xf32, #tpu.memory_space<vmem>>, vector<1x8x128xf32>,
    %c3_i32 = arith.constant 3 : i32
    %cst_19 = arith.constant dense<0.000000e+00> : vector<8x128xf32>
    %35 = tpu.matmul %30, %3, %cst_19 {dimension_numbers = #tpu.dot_dimension_numbers<[1], [0], [0], [1], [0, 0, 1, 1], [], []>} : vector<8x128xf32>, vector<128x128xf32>, vector<8x128xf32> -> vector<8x128xf32>
    %36 = arith.index_cast %c3_i32 : i32 to index
    %c0_20 = arith.constant 0 : index
    %c0_21 = arith.constant 0 : index
    %37 = vector.load %arg1[%36, %c0_20, %c0_21] : memref<8x8x128xf32, #tpu.memory_space<vmem>>, vector<1x8x128xf32>
    %38 = vector.shape_cast %37 : vector<1x8x128xf32> to vector<8x128xf32>
    %39 = arith.addf %35, %38 : vector<8x128xf32>
    %40 = math.tanh %39 : vector<8x128xf32>
    %41 = arith.index_cast %c3_i32 : i32 to index
    %c0_22 = arith.constant 0 : index
    %c0_23 = arith.constant 0 : index
    %42 = vector.load %arg3[%41, %c0_22, %c0_23] : memref<8x8x128xf32, #tpu.memory_space<vmem>>, vector<1x8x128xf32>
    %43 = vector.shape_cast %42 : vector<1x8x128xf32> to vector<8x128xf32>
    %44 = vector.shape_cast %40 : vector<8x128xf32> to vector<1x8x128xf32>
    tpu.vector_store %arg3[%41, %c0_22, %c0_23], %44 {strides = array<i32>} : memref<8x8x128xf32, #tpu.memory_space<vmem>>, vector<1x8x128xf32>,
    %c4_i32 = arith.constant 4 : i32
    %cst_24 = arith.constant dense<0.000000e+00> : vector<8x128xf32>
    %45 = tpu.matmul %40, %3, %cst_24 {dimension_numbers = #tpu.dot_dimension_numbers<[1], [0], [0], [1], [0, 0, 1, 1], [], []>} : vector<8x128xf32>, vector<128x128xf32>, vector<8x128xf32> -> vector<8x128xf32>
    %46 = arith.index_cast %c4_i32 : i32 to index
    %c0_25 = arith.constant 0 : index
    %c0_26 = arith.constant 0 : index
    %47 = vector.load %arg1[%46, %c0_25, %c0_26] : memref<8x8x128xf32, #tpu.memory_space<vmem>>, vector<1x8x128xf32>
    %48 = vector.shape_cast %47 : vector<1x8x128xf32> to vector<8x128xf32>
    %49 = arith.addf %45, %48 : vector<8x128xf32>
    %50 = math.tanh %49 : vector<8x128xf32>
    %51 = arith.index_cast %c4_i32 : i32 to index
    %c0_27 = arith.constant 0 : index
    %c0_28 = arith.constant 0 : index
    %52 = vector.load %arg3[%51, %c0_27, %c0_28] : memref<8x8x128xf32, #tpu.memory_space<vmem>>, vector<1x8x128xf32>
    %53 = vector.shape_cast %52 : vector<1x8x128xf32> to vector<8x128xf32>
    %54 = vector.shape_cast %50 : vector<8x128xf32> to vector<1x8x128xf32>
    tpu.vector_store %arg3[%51, %c0_27, %c0_28], %54 {strides = array<i32>} : memref<8x8x128xf32, #tpu.memory_space<vmem>>, vector<1x8x128xf32>,
    %c5_i32 = arith.constant 5 : i32
    %cst_29 = arith.constant dense<0.000000e+00> : vector<8x128xf32>
    %55 = tpu.matmul %50, %3, %cst_29 {dimension_numbers = #tpu.dot_dimension_numbers<[1], [0], [0], [1], [0, 0, 1, 1], [], []>} : vector<8x128xf32>, vector<128x128xf32>, vector<8x128xf32> -> vector<8x128xf32>
    %56 = arith.index_cast %c5_i32 : i32 to index
    %c0_30 = arith.constant 0 : index
    %c0_31 = arith.constant 0 : index
    %57 = vector.load %arg1[%56, %c0_30, %c0_31] : memref<8x8x128xf32, #tpu.memory_space<vmem>>, vector<1x8x128xf32>
    %58 = vector.shape_cast %57 : vector<1x8x128xf32> to vector<8x128xf32>
    %59 = arith.addf %55, %58 : vector<8x128xf32>
    %60 = math.tanh %59 : vector<8x128xf32>
    %61 = arith.index_cast %c5_i32 : i32 to index
    %c0_32 = arith.constant 0 : index
    %c0_33 = arith.constant 0 : index
    %62 = vector.load %arg3[%61, %c0_32, %c0_33] : memref<8x8x128xf32, #tpu.memory_space<vmem>>, vector<1x8x128xf32>
    %63 = vector.shape_cast %62 : vector<1x8x128xf32> to vector<8x128xf32>
    %64 = vector.shape_cast %60 : vector<8x128xf32> to vector<1x8x128xf32>
    tpu.vector_store %arg3[%61, %c0_32, %c0_33], %64 {strides = array<i32>} : memref<8x8x128xf32, #tpu.memory_space<vmem>>, vector<1x8x128xf32>,
    %c6_i32 = arith.constant 6 : i32
    %cst_34 = arith.constant dense<0.000000e+00> : vector<8x128xf32>
    %65 = tpu.matmul %60, %3, %cst_34 {dimension_numbers = #tpu.dot_dimension_numbers<[1], [0], [0], [1], [0, 0, 1, 1], [], []>} : vector<8x128xf32>, vector<128x128xf32>, vector<8x128xf32> -> vector<8x128xf32>
    %66 = arith.index_cast %c6_i32 : i32 to index
    %c0_35 = arith.constant 0 : index
    %c0_36 = arith.constant 0 : index
    %67 = vector.load %arg1[%66, %c0_35, %c0_36] : memref<8x8x128xf32, #tpu.memory_space<vmem>>, vector<1x8x128xf32>
    %68 = vector.shape_cast %67 : vector<1x8x128xf32> to vector<8x128xf32>
    %69 = arith.addf %65, %68 : vector<8x128xf32>
    %70 = math.tanh %69 : vector<8x128xf32>
    %71 = arith.index_cast %c6_i32 : i32 to index
    %c0_37 = arith.constant 0 : index
    %c0_38 = arith.constant 0 : index
    %72 = vector.load %arg3[%71, %c0_37, %c0_38] : memref<8x8x128xf32, #tpu.memory_space<vmem>>, vector<1x8x128xf32>
    %73 = vector.shape_cast %72 : vector<1x8x128xf32> to vector<8x128xf32>
    %74 = vector.shape_cast %70 : vector<8x128xf32> to vector<1x8x128xf32>
    tpu.vector_store %arg3[%71, %c0_37, %c0_38], %74 {strides = array<i32>} : memref<8x8x128xf32, #tpu.memory_space<vmem>>, vector<1x8x128xf32>,
    %c7_i32 = arith.constant 7 : i32
    %cst_39 = arith.constant dense<0.000000e+00> : vector<8x128xf32>
    %75 = tpu.matmul %70, %3, %cst_39 {dimension_numbers = #tpu.dot_dimension_numbers<[1], [0], [0], [1], [0, 0, 1, 1], [], []>} : vector<8x128xf32>, vector<128x128xf32>, vector<8x128xf32> -> vector<8x128xf32>
    %76 = arith.index_cast %c7_i32 : i32 to index
    %c0_40 = arith.constant 0 : index
    %c0_41 = arith.constant 0 : index
    %77 = vector.load %arg1[%76, %c0_40, %c0_41] : memref<8x8x128xf32, #tpu.memory_space<vmem>>, vector<1x8x128xf32>
    %78 = vector.shape_cast %77 : vector<1x8x128xf32> to vector<8x128xf32>
    %79 = arith.addf %75, %78 : vector<8x128xf32>
    %80 = math.tanh %79 : vector<8x128xf32>
    %81 = arith.index_cast %c7_i32 : i32 to index
    %c0_42 = arith.constant 0 : index
    %c0_43 = arith.constant 0 : index
    %82 = vector.load %arg3[%81, %c0_42, %c0_43] : memref<8x8x128xf32, #tpu.memory_space<vmem>>, vector<1x8x128xf32>
    %83 = vector.shape_cast %82 : vector<1x8x128xf32> to vector<8x128xf32>
    %84 = vector.shape_cast %80 : vector<8x128xf32> to vector<1x8x128xf32>
    tpu.vector_store %arg3[%81, %c0_42, %c0_43], %84 {strides = array<i32>} : memref<8x8x128xf32, #tpu.memory_space<vmem>>, vector<1x8x128xf32>,
    %c8_i32 = arith.constant 8 : i32
    %c0_44 = arith.constant 0 : index
    %c0_45 = arith.constant 0 : index
    %85 = vector.load %arg4[%c0_44, %c0_45] : memref<8x128xf32, #tpu.memory_space<vmem>>, vector<8x128xf32>
    tpu.vector_store %arg4[%c0_44, %c0_45], %80 {strides = array<i32>} : memref<8x128xf32, #tpu.memory_space<vmem>>, vector<8x128xf32>,
    return
  }
  func.func @transform_0(%arg0: i32) -> (i32, i32, i32) {
    %c0_i32 = arith.constant 0 : i32
    %c0_i32_0 = arith.constant 0 : i32
    %c0_i32_1 = arith.constant 0 : i32
    return %arg0, %c0_i32, %c0_i32_0 : i32, i32, i32
  }
  func.func @transform_1(%arg0: i32) -> (i32, i32) {
    %c0_i32 = arith.constant 0 : i32
    %c0_i32_0 = arith.constant 0 : i32
    %c0_i32_1 = arith.constant 0 : i32
    return %c0_i32, %c0_i32_0 : i32, i32
  }
  func.func @transform_2(%arg0: i32) -> (i32, i32, i32) {
    %c0_i32 = arith.constant 0 : i32
    %c0_i32_0 = arith.constant 0 : i32
    %c0_i32_1 = arith.constant 0 : i32
    return %arg0, %c0_i32, %c0_i32_0 : i32, i32, i32
  }
}

</mosaic_0001>

<bundles_post_ra>
// kernel: tpu_custom_call.1
= control target key start
LH: loop header
LB: loop body
LE: loop exit
PB: predicated region body
PF: predicated region fallthrough
CT: control target
= control target key end

     0   :  { %7 = vsyncpa [#allocation4], 0  ;;  %s584_s0 = inlined_call_operand.hbm [shape: f32[8,8,128], index: 0, kind: input, shape index: {}]   ;;  %s585_s1 = inlined_call_operand.hbm [shape: f32[128,128], index: 1, kind: input, shape index: {}]   ;;  %s586_s2 = inlined_call_operand.hbm [shape: f32[8,8,128], index: 2, kind: output, shape index: {}]  }
   0x1   :  { %8 = vsyncpa [#allocation7], 0 }
   0x2   :  { %9 = vsyncpa [#allocation5], 0  ;;  %s14_s11 = sshll.u32 %s584_s0, 4  ;;  %s385_s12 = smov [#allocation3]   ;;  %s15_s11 = int_to_ptr.hbm [resolvable:$true] %s14_s11 }
   0x3   :  { %s16_s13 = sshll.u32 %s385_s12, 4  ;;  %s27_s16 = sshll.u32 %s585_s1, 4  ;;  %s17_s13 = int_to_ptr.vmem [resolvable:$true] %s16_s13  ;;  %s28_s16 = int_to_ptr.hbm [resolvable:$true] %s27_s16 }
   0x4   :  { %s386_s17 = smov 128   ;;  %s387_s18 = smov 8  }
   0x5   :  { %22 = dma.hbm_to_vmem [thread:$0]  %s15_s11, 1024, %s17_s13, [#allocation4], %s386_s17, %s386_s17, %s387_s18  }
   0x6   :  { %s388_s19 = smov [#allocation6]  }
   0x7   :  { %s29_s20 = sshll.u32 %s388_s19, 4  ;;  %s30_s20 = int_to_ptr.vmem [resolvable:$true] %s29_s20 }
   0x8   :  { %35 = dma.hbm_to_vmem [thread:$0]  %s28_s16, 2048, %s30_s20, [#allocation7], %s386_s17, %s386_s17, %s387_s18  }
   0x9   :  { %379 = dma.done.wait [#allocation4], 1024  }
   0xa   :  { %380 = vsyncadd [#allocation4], 4294966272 }
   0xb   :  { %381 = dma.done.wait [#allocation7], 2048  }
   0xc   :  { %382 = vsyncadd [#allocation7], 4294965248  ;;  %v418_v0 = vld [vmem:[#allocation6 + $0x78] sm:$0xff]  ;;  %v420_v1 = vld [vmem:[#allocation6 + $0x70] sm:$0xff]  ;;  %v389_v16 = vmov 0.0   ;;  %s390_s0 = smov [#allocation8]  }
   0xd   :  { %67 = vmatpush.msra.mxu0 %v418_v0  ;;  %91 = vmatpush.msra.mxu1 %v418_v0  ;;  %v424_v2 = vld [vmem:[#allocation6 + $0x68] sm:$0xff]  ;;  %v430_v3 = vld [vmem:[#allocation6 + $0x60] sm:$0xff]  ;;  %v436_v4 = vld [vmem:[#allocation6 + $0x58] sm:$0xff]  ;;  %s269_s1 = sshll.u32 %s390_s0, 4  ;;  %s271_s23 = sshll.u32 %s586_s2, 4  ;;  %s270_s1 = int_to_ptr.vmem [resolvable:$true] %s269_s1  ;;  %s272_s23 = int_to_ptr.hbm [resolvable:$true] %s271_s23 }
   0xe   :  { %116 = vmatpush.msra.mxu2 %v418_v0  ;;  %141 = vmatpush.msra.mxu3 %v418_v0  ;;  %v442_v5 = vld [vmem:[#allocation6 + $0x50] sm:$0xff]  ;;  %v448_v6 = vld [vmem:[#allocation6 + $0x48] sm:$0xff]  ;;  %v454_v7 = vld [vmem:[#allocation6 + $0x40] sm:$0xff] }
   0xf   :  { %68 = vmatpush.msra.mxu0 %v420_v1  ;;  %92 = vmatpush.msra.mxu1 %v420_v1  ;;  %v460_v8 = vld [vmem:[#allocation6 + $0x38] sm:$0xff]  ;;  %v466_v9 = vld [vmem:[#allocation6 + $0x30] sm:$0xff]  ;;  %v472_v10 = vld [vmem:[#allocation6 + $0x28] sm:$0xff] }
  0x10   :  { %117 = vmatpush.msra.mxu2 %v420_v1  ;;  %142 = vmatpush.msra.mxu3 %v420_v1  ;;  %v478_v11 = vld [vmem:[#allocation6 + $0x20] sm:$0xff]  ;;  %v484_v12 = vld [vmem:[#allocation6 + $0x18] sm:$0xff]  ;;  %v490_v13 = vld [vmem:[#allocation6 + $0x10] sm:$0xff] }
  0x11   :  { %69 = vmatpush.msra.mxu0 %v424_v2  ;;  %93 = vmatpush.msra.mxu1 %v424_v2  ;;  %v496_v14 = vld [vmem:[#allocation6 + $0x8] sm:$0xff]  ;;  %v502_v15 = vld [vmem:[#allocation6] sm:$0xff]  ;;  %v115_v25 = vld [vmem:[#allocation3 + $0x10] sm:$0xff] }
  0x12   :  { %118 = vmatpush.msra.mxu2 %v424_v2  ;;  %143 = vmatpush.msra.mxu3 %v424_v2  ;;  %v66_v17 = vld [vmem:[#allocation3] sm:$0xff]  ;;  %v90_v21 = vld [vmem:[#allocation3 + $0x8] sm:$0xff]  ;;  %v140_v29 = vld [vmem:[#allocation3 + $0x18] sm:$0xff] }
  0x13   :  { %70 = vmatpush.msra.mxu0 %v430_v3  ;;  %94 = vmatpush.msra.mxu1 %v430_v3  ;;  %v165_v33 = vld [vmem:[#allocation3 + $0x20] sm:$0xff]  ;;  %v190_v37 = vld [vmem:[#allocation3 + $0x28] sm:$0xff]  ;;  %v215_v41 = vld [vmem:[#allocation3 + $0x30] sm:$0xff] }
  0x14   :  { %119 = vmatpush.msra.mxu2 %v430_v3  ;;  %144 = vmatpush.msra.mxu3 %v430_v3  ;;  %v240_v45 = vld [vmem:[#allocation3 + $0x38] sm:$0xff] }
  0x15   :  { %71 = vmatpush.msra.mxu0 %v436_v4  ;;  %95 = vmatpush.msra.mxu1 %v436_v4 }
  0x16   :  { %120 = vmatpush.msra.mxu2 %v436_v4  ;;  %145 = vmatpush.msra.mxu3 %v436_v4 }
  0x17   :  { %72 = vmatpush.msra.mxu0 %v442_v5  ;;  %96 = vmatpush.msra.mxu1 %v442_v5 }
  0x18   :  { %121 = vmatpush.msra.mxu2 %v442_v5  ;;  %146 = vmatpush.msra.mxu3 %v442_v5 }
  0x19   :  { %73 = vmatpush.msra.mxu0 %v448_v6  ;;  %97 = vmatpush.msra.mxu1 %v448_v6 }
  0x1a   :  { %122 = vmatpush.msra.mxu2 %v448_v6  ;;  %147 = vmatpush.msra.mxu3 %v448_v6 }
  0x1b   :  { %74 = vmatpush.msra.mxu0 %v454_v7  ;;  %98 = vmatpush.msra.mxu1 %v454_v7 }
  0x1c   :  { %123 = vmatpush.msra.mxu2 %v454_v7  ;;  %148 = vmatpush.msra.mxu3 %v454_v7 }
  0x1d   :  { %75 = vmatpush.msra.mxu0 %v460_v8  ;;  %99 = vmatpush.msra.mxu1 %v460_v8 }
  0x1e   :  { %124 = vmatpush.msra.mxu2 %v460_v8  ;;  %149 = vmatpush.msra.mxu3 %v460_v8 }
  0x1f   :  { %76 = vmatpush.msra.mxu0 %v466_v9  ;;  %100 = vmatpush.msra.mxu1 %v466_v9 }
  0x20   :  { %125 = vmatpush.msra.mxu2 %v466_v9  ;;  %150 = vmatpush.msra.mxu3 %v466_v9 }
  0x21   :  { %77 = vmatpush.msra.mxu0 %v472_v10  ;;  %101 = vmatpush.msra.mxu1 %v472_v10 }
  0x22   :  { %126 = vmatpush.msra.mxu2 %v472_v10  ;;  %151 = vmatpush.msra.mxu3 %v472_v10 }
  0x23   :  { %78 = vmatpush.msra.mxu0 %v478_v11  ;;  %102 = vmatpush.msra.mxu1 %v478_v11 }
  0x24   :  { %127 = vmatpush.msra.mxu2 %v478_v11  ;;  %152 = vmatpush.msra.mxu3 %v478_v11 }
  0x25   :  { %79 = vmatpush.msra.mxu0 %v484_v12  ;;  %103 = vmatpush.msra.mxu1 %v484_v12 }
  0x26   :  { %128 = vmatpush.msra.mxu2 %v484_v12  ;;  %153 = vmatpush.msra.mxu3 %v484_v12 }
  0x27   :  { %80 = vmatpush.msra.mxu0 %v490_v13  ;;  %104 = vmatpush.msra.mxu1 %v490_v13 }
  0x28   :  { %129 = vmatpush.msra.mxu2 %v490_v13  ;;  %154 = vmatpush.msra.mxu3 %v490_v13 }
  0x29   :  { %81 = vmatpush.msra.mxu0 %v496_v14  ;;  %105 = vmatpush.msra.mxu1 %v496_v14 }
  0x2a   :  { %130 = vmatpush.msra.mxu2 %v496_v14  ;;  %155 = vmatpush.msra.mxu3 %v496_v14 }
  0x2b   :  { %82 = vmatpush.msra.mxu0 %v502_v15  ;;  %106 = vmatpush.msra.mxu1 %v502_v15 }
  0x2c   :  { %83 = vmatmul.f32.vlgmr.msra.gmra.mxu0 %v389_v16  ;;  %131 = vmatpush.msra.mxu2 %v502_v15 }
  0x2d   :  { %156 = vmatpush.msra.mxu3 %v502_v15  ;;  %166 = vmatpush.msrb.mxu0 %v418_v0 }
  0x2e   :  { %191 = vmatpush.msrb.mxu1 %v418_v0  ;;  %216 = vmatpush.msrb.mxu2 %v418_v0 }
  0x2f   :  { %167 = vmatpush.msrb.mxu0 %v420_v1  ;;  %241 = vmatpush.msrb.mxu3 %v418_v0 }
  0x30   :  { %192 = vmatpush.msrb.mxu1 %v420_v1  ;;  %217 = vmatpush.msrb.mxu2 %v420_v1 }
  0x31   :  { %168 = vmatpush.msrb.mxu0 %v424_v2  ;;  %242 = vmatpush.msrb.mxu3 %v420_v1 }
  0x32   :  { %193 = vmatpush.msrb.mxu1 %v424_v2  ;;  %218 = vmatpush.msrb.mxu2 %v424_v2 }
  0x33   :  { %169 = vmatpush.msrb.mxu0 %v430_v3  ;;  %243 = vmatpush.msrb.mxu3 %v424_v2 }
  0x34   :  { %194 = vmatpush.msrb.mxu1 %v430_v3  ;;  %219 = vmatpush.msrb.mxu2 %v430_v3 }
  0x35   :  { %170 = vmatpush.msrb.mxu0 %v436_v4  ;;  %244 = vmatpush.msrb.mxu3 %v430_v3 }
  0x36   :  { %195 = vmatpush.msrb.mxu1 %v436_v4  ;;  %220 = vmatpush.msrb.mxu2 %v436_v4 }
  0x37   :  { %171 = vmatpush.msrb.mxu0 %v442_v5  ;;  %245 = vmatpush.msrb.mxu3 %v436_v4 }
  0x38   :  { %196 = vmatpush.msrb.mxu1 %v442_v5  ;;  %221 = vmatpush.msrb.mxu2 %v442_v5 }
  0x39   :  { %172 = vmatpush.msrb.mxu0 %v448_v6  ;;  %246 = vmatpush.msrb.mxu3 %v442_v5 }
  0x3a   :  { %197 = vmatpush.msrb.mxu1 %v448_v6  ;;  %222 = vmatpush.msrb.mxu2 %v448_v6 }
  0x3b   :  { %173 = vmatpush.msrb.mxu0 %v454_v7  ;;  %247 = vmatpush.msrb.mxu3 %v448_v6 }
  0x3c   :  { %198 = vmatpush.msrb.mxu1 %v454_v7  ;;  %223 = vmatpush.msrb.mxu2 %v454_v7 }
  0x3d   :  { %174 = vmatpush.msrb.mxu0 %v460_v8  ;;  %248 = vmatpush.msrb.mxu3 %v454_v7 }
  0x3e   :  { %199 = vmatpush.msrb.mxu1 %v460_v8  ;;  %224 = vmatpush.msrb.mxu2 %v460_v8 }
  0x3f   :  { %175 = vmatpush.msrb.mxu0 %v466_v9  ;;  %249 = vmatpush.msrb.mxu3 %v460_v8 }
  0x40   :  { %200 = vmatpush.msrb.mxu1 %v466_v9  ;;  %225 = vmatpush.msrb.mxu2 %v466_v9 }
  0x41   :  { %176 = vmatpush.msrb.mxu0 %v472_v10  ;;  %250 = vmatpush.msrb.mxu3 %v466_v9 }
  0x42   :  { %201 = vmatpush.msrb.mxu1 %v472_v10  ;;  %226 = vmatpush.msrb.mxu2 %v472_v10 }
  0x43   :  { %177 = vmatpush.msrb.mxu0 %v478_v11  ;;  %251 = vmatpush.msrb.mxu3 %v472_v10 }
  0x44   :  { %202 = vmatpush.msrb.mxu1 %v478_v11  ;;  %227 = vmatpush.msrb.mxu2 %v478_v11 }
  0x45   :  { %178 = vmatpush.msrb.mxu0 %v484_v12  ;;  %252 = vmatpush.msrb.mxu3 %v478_v11 }
  0x46   :  { %203 = vmatpush.msrb.mxu1 %v484_v12  ;;  %228 = vmatpush.msrb.mxu2 %v484_v12 }
  0x47   :  { %179 = vmatpush.msrb.mxu0 %v490_v13  ;;  %253 = vmatpush.msrb.mxu3 %v484_v12 }
  0x48   :  { %204 = vmatpush.msrb.mxu1 %v490_v13  ;;  %229 = vmatpush.msrb.mxu2 %v490_v13 }
  0x49   :  { %180 = vmatpush.msrb.mxu0 %v496_v14  ;;  %254 = vmatpush.msrb.mxu3 %v490_v13 }
  0x4a   :  { %205 = vmatpush.msrb.mxu1 %v496_v14  ;;  %230 = vmatpush.msrb.mxu2 %v496_v14 }
  0x4b   :  { %181 = vmatpush.msrb.mxu0 %v502_v15  ;;  %255 = vmatpush.msrb.mxu3 %v496_v14 }
  0x4c   :  { %206 = vmatpush.msrb.mxu1 %v502_v15  ;;  %231 = vmatpush.msrb.mxu2 %v502_v15 }
  0x4d   :  { %256 = vmatpush.msrb.mxu3 %v502_v15 }
  0xa9   :  { %v84_v18 = vpop.f32.mrf.mxu0 }
  0xaa   :  { %v85_v19 = vadd.f32 %v84_v18, %v66_v17 }
  0xac   :  { %291 = vtanh.f32 %v85_v19 }
  0xb2   :  { %v292_v20 = vpop.eup %291 }
  0xb3   :  { %88 = vst [vmem:[#allocation8] sm:$0xff] %v292_v20  ;;  %107 = vmatmul.f32.vlgmr.msra.gmra.mxu1 %v292_v20 }
 0x130   :  { %v108_v22 = vpop.f32.mrf.mxu1 }
 0x131   :  { %v109_v23 = vadd.f32 %v108_v22, %v90_v21 }
 0x133   :  { %293 = vtanh.f32 %v109_v23 }
 0x139   :  { %v294_v24 = vpop.eup %293 }
 0x13a   :  { %113 = vst [vmem:[#allocation8 + $0x8] sm:$0xff] %v294_v24  ;;  %132 = vmatmul.f32.vlgmr.msra.gmra.mxu2 %v294_v24 }
 0x1bd   :  { %v133_v26 = vpop.f32.mrf.mxu2 }
 0x1be   :  { %v134_v27 = vadd.f32 %v133_v26, %v115_v25 }
 0x1c0   :  { %295 = vtanh.f32 %v134_v27 }
 0x1c6   :  { %v296_v28 = vpop.eup %295 }
 0x1c7   :  { %138 = vst [vmem:[#allocation8 + $0x10] sm:$0xff] %v296_v28  ;;  %157 = vmatmul.f32.vlgmr.msra.gmra.mxu3 %v296_v28 }
 0x24a   :  { %v158_v30 = vpop.f32.mrf.mxu3 }
 0x24b   :  { %v159_v31 = vadd.f32 %v158_v30, %v140_v29 }
 0x24d   :  { %297 = vtanh.f32 %v159_v31 }
 0x253   :  { %v298_v32 = vpop.eup %297 }
 0x254   :  { %163 = vst [vmem:[#allocation8 + $0x18] sm:$0xff] %v298_v32  ;;  %182 = vmatmul.f32.vlgmr.msrb.gmra.mxu0 %v298_v32 }
 0x2d1   :  { %v183_v34 = vpop.f32.mrf.mxu0 }
 0x2d2   :  { %v184_v35 = vadd.f32 %v183_v34, %v165_v33 }
 0x2d4   :  { %299 = vtanh.f32 %v184_v35 }
 0x2da   :  { %v300_v36 = vpop.eup %299 }
 0x2db   :  { %188 = vst [vmem:[#allocation8 + $0x20] sm:$0xff] %v300_v36  ;;  %207 = vmatmul.f32.vlgmr.msrb.gmra.mxu1 %v300_v36 }
 0x358   :  { %v208_v38 = vpop.f32.mrf.mxu1 }
 0x359   :  { %v209_v39 = vadd.f32 %v208_v38, %v190_v37 }
 0x35b   :  { %301 = vtanh.f32 %v209_v39 }
 0x361   :  { %v302_v40 = vpop.eup %301 }
 0x362   :  { %213 = vst [vmem:[#allocation8 + $0x28] sm:$0xff] %v302_v40  ;;  %232 = vmatmul.f32.vlgmr.msrb.gmra.mxu2 %v302_v40 }
 0x3e5   :  { %v233_v42 = vpop.f32.mrf.mxu2 }
 0x3e6   :  { %v234_v43 = vadd.f32 %v233_v42, %v215_v41 }
 0x3e8   :  { %303 = vtanh.f32 %v234_v43 }
 0x3ee   :  { %v304_v44 = vpop.eup %303 }
 0x3ef   :  { %238 = vst [vmem:[#allocation8 + $0x30] sm:$0xff] %v304_v44  ;;  %257 = vmatmul.f32.vlgmr.msrb.gmra.mxu3 %v304_v44 }
 0x472   :  { %v258_v46 = vpop.f32.mrf.mxu3 }
 0x473   :  { %v259_v47 = vadd.f32 %v258_v46, %v240_v45 }
 0x475   :  { %305 = vtanh.f32 %v259_v47 }
 0x47b   :  { %v306_v48 = vpop.eup %305 }
 0x47c   :  { %263 = vst [vmem:[#allocation8 + $0x38] sm:$0xff] %v306_v48 }
 0x47d   :  { %277 = dma.vmem_to_hbm [thread:$0]  %s270_s1, 1024, %s272_s23, [#allocation5], %s386_s17, %s386_s17, %s387_s18  }
 0x47e   :  { %383 = dma.done.wait [#allocation5], 1024  }
 0x47f   :  { %384 = vsyncadd [#allocation5], 4294966272 }
 0x480   :  { %282 = vsyncpa [#allocation4], 1 }
 0x481   :  { %283 = vsyncpa [#allocation7], 1 }
 0x482   :  { %284 = vsyncpa [#allocation5], 1 }

</bundles_post_ra>
